<compile_context>
chip_gen: v6e
topology: v6e:2x2x1
jax: 0.10.0
libtpu: 0.0.40
codegen_flags: <defaults>
</compile_context>

<pallas_src>
import functools

import jax
import jax.numpy as jnp
from jax.experimental import pallas as pl
from jax.experimental.pallas import tpu as pltpu


def _round_up(x, m):
    return ((x + m - 1) // m) * m


def _cdiv(a, b):
    return -(-a // b)


def _pick_block_rows(B, max_block_rows):
    """Adaptive row tile: pad rows only to sublane granularity, keep >=2 grid
    steps when there is enough work (v7x dual-TC sharding), then shrink the
    block to minimize padding without changing the step count."""
    rows = _round_up(B, 8)
    block = min(max_block_rows, rows)
    if rows >= 16:
        block = min(block, _round_up(_cdiv(rows, 2), 8))
    block = max(block, 8)
    n_steps = _cdiv(rows, block)
    block = _round_up(_cdiv(rows, n_steps), 8)
    return block, n_steps


# ----------------------------------------------------------------------------
# Kernel
# ----------------------------------------------------------------------------
def _rnn_kernel(hp, n_sub, sub_rows,
                obs_ref, h_ref,
                w1_ref, b1_ref,          # fc1:            (Kp, Hp),   (1, Hp)
                wrz_ref, brz_ref,        # fused r|z:      (2Hp, 2Hp), (1, 2Hp)
                win_ref, bin_ref,        # GRU Wih_n:      (Hp, Hp),   (1, Hp)
                whn_ref, bhn_ref,        # GRU Whh_n:      (Hp, Hp),   (1, Hp)
                w2_ref, b2_ref,          # fc2:            (Hp, Ap),   (1, Ap)
                q_ref, h_out_ref):
    # Weights loaded once per grid step (resident in VMEM across the body).
    w1 = w1_ref[...]
    wrz = wrz_ref[...]
    win = win_ref[...]
    whn = whn_ref[...]
    w2 = w2_ref[...]
    wdt = w1.dtype

    # Static unrolled loop over independent row sub-chunks lets the scheduler
    # overlap one chunk's MXU work with the other chunk's EUP transcendentals.
    for c in range(n_sub):
        sl = slice(c * sub_rows, (c + 1) * sub_rows)

        obs = obs_ref[sl, :].astype(jnp.float32)      # (sub, Kp)
        h = h_ref[sl, :].astype(jnp.float32)          # (sub, Hp)

        # fc1 + ReLU
        x = jnp.dot(obs.astype(wdt), w1,
                    preferred_element_type=jnp.float32) + b1_ref[...]
        x = jnp.maximum(x, 0.0)                       # (sub, Hp) f32

        # Fused r/z gate projection on the stacked input [x | h]:
        # one (sub, 2Hp) @ (2Hp, 2Hp) matmul yields i_r+h_r | i_z+h_z.
        xh = jnp.concatenate([x, h], axis=1).astype(wdt)   # (sub, 2Hp)
        g_rz = jnp.dot(xh, wrz,
                       preferred_element_type=jnp.float32) + brz_ref[...]
        r = jax.nn.sigmoid(g_rz[:, :hp])              # 128-aligned slices
        z = jax.nn.sigmoid(g_rz[:, hp:])

        # Candidate gate: i_n and h_n stay separate (h_n scaled by r).
        i_n = jnp.dot(x.astype(wdt), win,
                      preferred_element_type=jnp.float32) + bin_ref[...]
        h_n = jnp.dot(h.astype(wdt), whn,
                      preferred_element_type=jnp.float32) + bhn_ref[...]
        n = jnp.tanh(i_n + r * h_n)

        h_new = (1.0 - z) * n + z * h                 # (sub, Hp) f32
        h_out_ref[sl, :] = h_new.astype(h_out_ref.dtype)

        # fc2
        q = jnp.dot(h_new.astype(wdt), w2,
                    preferred_element_type=jnp.float32) + b2_ref[...]
        q_ref[sl, :] = q.astype(q_ref.dtype)


# ----------------------------------------------------------------------------
# Parameter padding / repacking (done once per call, outside the kernel)
# ----------------------------------------------------------------------------
def _prep_params(params, K, H, A, Kp, Hp, Ap, w_dtype):
    f32 = jnp.float32

    def pad2(w, rows, cols):
        w = jnp.asarray(w, f32)
        return jnp.pad(w, ((0, rows - w.shape[0]), (0, cols - w.shape[1])))

    def gate_cols(w, g):
        return jnp.asarray(w, f32)[:, g * H:(g + 1) * H]

    def gate_bias(b, g):
        return jnp.asarray(b, f32)[g * H:(g + 1) * H]

    # fc1 (zero rows for the padded obs columns multiply zeros).
    w1 = pad2(params["w1"], Kp, Hp)
    b1 = jnp.pad(jnp.asarray(params["b1"], f32), (0, Hp - H))[None, :]

    # Fused r/z projection on stacked [x | h]:
    #   [x h] @ [[Wih_r  Wih_z]
    #            [Whh_r  Whh_z]]  + (bih_r + bhh_r | bih_z + bhh_z)
    wih, whh = params["wih"], params["whh"]
    bih, bhh = params["bih"], params["bhh"]
    top = jnp.concatenate([pad2(gate_cols(wih, 0), Hp, Hp),
                           pad2(gate_cols(wih, 1), Hp, Hp)], axis=1)
    bot = jnp.concatenate([pad2(gate_cols(whh, 0), Hp, Hp),
                           pad2(gate_cols(whh, 1), Hp, Hp)], axis=1)
    w_rz = jnp.concatenate([top, bot], axis=0)                  # (2Hp, 2Hp)
    b_rz = jnp.concatenate(
        [jnp.pad(gate_bias(bih, 0) + gate_bias(bhh, 0), (0, Hp - H)),
         jnp.pad(gate_bias(bih, 1) + gate_bias(bhh, 1), (0, Hp - H))])[None, :]

    # Candidate gate kept as two separate Hp x Hp projections.
    w_in = pad2(gate_cols(wih, 2), Hp, Hp)
    b_in = jnp.pad(gate_bias(bih, 2), (0, Hp - H))[None, :]
    w_hn = pad2(gate_cols(whh, 2), Hp, Hp)
    b_hn = jnp.pad(gate_bias(bhh, 2), (0, Hp - H))[None, :]

    # fc2
    w2 = pad2(params["w2"], Hp, Ap)
    b2 = jnp.pad(jnp.asarray(params["b2"], f32), (0, Ap - A))[None, :]

    weights = [w.astype(w_dtype) for w in (w1, w_rz, w_in, w_hn, w2)]
    biases = [b1, b_rz, b_in, b_hn, b2]   # biases stay f32 (added post-MXU)
    return weights, biases


# ----------------------------------------------------------------------------
# Wrapper
# ----------------------------------------------------------------------------
def rnn_forward(obs, hidden_state, params, *, rnn_hidden_dim, n_actions,
                max_block_rows=256, use_bf16_weights=False):
    """obs: (B, input_shape), hidden_state: any shape reshapable to (B, H).

    Returns (q, h) with q: (B, n_actions), h: (B, rnn_hidden_dim),
    matching the PyTorch RNN.forward semantics.
    """
    obs = jnp.asarray(obs, jnp.float32)
    B, K = obs.shape
    H, A = rnn_hidden_dim, n_actions
    h_in = jnp.asarray(hidden_state, jnp.float32).reshape(-1, H)
    assert h_in.shape[0] == B

    Kp = _round_up(K, 128)          # lane-dense obs feature width
    Hp = _round_up(H, 128)          # lane-dense hidden width
    Ap = _round_up(A, 128)          # lane-dense action width

    block_rows, n_steps = _pick_block_rows(B, max_block_rows)
    Np = block_rows * n_steps

    obs_p = jnp.pad(obs, ((0, Np - B), (0, Kp - K)))
    h_p = jnp.pad(h_in, ((0, Np - B), (0, Hp - H)))

    w_dtype = jnp.bfloat16 if use_bf16_weights else jnp.float32
    weights, biases = _prep_params(params, K, H, A, Kp, Hp, Ap, w_dtype)
    w1, w_rz, w_in, w_hn, w2 = weights
    b1, b_rz, b_in, b_hn, b2 = biases

    # Split large row tiles into two independent sub-chunks (MXU/EUP overlap).
    n_sub = 2 if (block_rows >= 128 and block_rows % 16 == 0) else 1
    sub_rows = block_rows // n_sub

    row_spec = lambda feat: pl.BlockSpec((block_rows, feat), lambda i: (i, 0))
    full_spec = lambda arr: pl.BlockSpec(arr.shape, lambda i: (0, 0))

    kernel = functools.partial(_rnn_kernel, Hp, n_sub, sub_rows)

    # Raise the scoped-VMEM limit only when the estimated footprint exceeds
    # the 32 MiB default (cap at 64 MiB: safe on every generation incl. v7x).
    w_item = 2 if use_bf16_weights else 4
    weight_bytes = sum(int(w.size) * w_item for w in weights)
    bias_bytes = sum(int(b.size) * 4 for b in biases)
    io_bytes = block_rows * (Kp + 2 * Hp + Ap) * 4
    scratch_bytes = block_rows * (8 * Hp) * 4
    est = 2 * (weight_bytes + bias_bytes + io_bytes) + scratch_bytes
    vmem_limit = None if est <= (32 << 20) else min(int(est * 5 // 4), 64 << 20)

    q_pad, h_pad = pl.pallas_call(
        kernel,
        out_shape=(jax.ShapeDtypeStruct((Np, Ap), jnp.float32),
                   jax.ShapeDtypeStruct((Np, Hp), jnp.float32)),
        grid_spec=pltpu.PrefetchScalarGridSpec(
            num_scalar_prefetch=0,
            grid=(n_steps,),
            in_specs=[
                row_spec(Kp),                       # obs (padded lanes)
                row_spec(Hp),                       # hidden state (padded lanes)
                full_spec(w1), full_spec(b1),
                full_spec(w_rz), full_spec(b_rz),
                full_spec(w_in), full_spec(b_in),
                full_spec(w_hn), full_spec(b_hn),
                full_spec(w2), full_spec(b2),
            ],
            out_specs=(row_spec(Ap), row_spec(Hp)),
        ),
        compiler_params=pltpu.CompilerParams(
            dimension_semantics=("parallel",),
            vmem_limit_bytes=vmem_limit),
    )(obs_p, h_p, w1, b1, w_rz, b_rz, w_in, b_in, w_hn, b_hn, w2, b2)

    return q_pad[:B, :A], h_pad[:B, :H]


# ----------------------------------------------------------------------------
# Pure-JAX reference (mirrors torch: fc1 -> relu -> GRUCell -> fc2)
# ----------------------------------------------------------------------------
def rnn_reference(obs, hidden_state, params, *, rnn_hidden_dim, n_actions):
    H = rnn_hidden_dim
    obs = jnp.asarray(obs, jnp.float32)
    h = jnp.asarray(hidden_state, jnp.float32).reshape(-1, H)
    p = params
    x = jnp.maximum(obs @ p["w1"] + p["b1"], 0.0)
    gi = x @ p["wih"] + p["bih"]
    gh = h @ p["whh"] + p["bhh"]
    i_r, i_z, i_n = jnp.split(gi, 3, axis=1)
    h_r, h_z, h_n = jnp.split(gh, 3, axis=1)
    r = jax.nn.sigmoid(i_r + h_r)
    z = jax.nn.sigmoid(i_z + h_z)
    n = jnp.tanh(i_n + r * h_n)
    h_new = (1.0 - z) * n + z * h
    q = h_new @ p["w2"] + p["b2"]
    return q, h_new


def init_params(key, *, input_shape, rnn_hidden_dim, n_actions):
    """PyTorch-style uniform init; weights stored transposed ((in, out))."""
    H = rnn_hidden_dim
    ks = jax.random.split(key, 8)

    def uni(k, shape, bound):
        return jax.random.uniform(k, shape, jnp.float32, -bound, bound)

    b_fc1 = 1.0 / float(input_shape) ** 0.5
    b_gru = 1.0 / float(H) ** 0.5
    b_fc2 = 1.0 / float(H) ** 0.5
    return dict(
        w1=uni(ks[0], (input_shape, H), b_fc1), b1=uni(ks[1], (H,), b_fc1),
        wih=uni(ks[2], (H, 3 * H), b_gru),      bih=uni(ks[3], (3 * H,), b_gru),
        whh=uni(ks[4], (H, 3 * H), b_gru),      bhh=uni(ks[5], (3 * H,), b_gru),
        w2=uni(ks[6], (H, n_actions), b_fc2),   b2=uni(ks[7], (n_actions,), b_fc2),
    )


if __name__ == "__main__":
    # Small shapes consistent with the module: 4 agents x 4 envs = 16 rows,
    # obs dim 32, rnn_hidden_dim 64, n_actions 12.
    input_shape, rnn_hidden_dim, n_actions = 32, 64, 12
    n_agents, n_envs = 4, 4
    B = n_agents * n_envs

    key = jax.random.PRNGKey(0)
    ko, kh, kp = jax.random.split(key, 3)
    obs = jax.random.normal(ko, (B, input_shape), jnp.float32)
    hidden = jax.random.normal(kh, (B, rnn_hidden_dim), jnp.float32)
    params = init_params(kp, input_shape=input_shape,
                         rnn_hidden_dim=rnn_hidden_dim, n_actions=n_actions)

    # f32 weights in the demo; set use_bf16_weights=True on v6e/v7x for the
    # bf16 MXU path (loosen tolerance to ~1e-2 if doing so).
    q, h = rnn_forward(obs, hidden, params,
                       rnn_hidden_dim=rnn_hidden_dim, n_actions=n_actions)
    q, h = jax.block_until_ready((q, h))

    q_ref, h_ref = rnn_reference(obs, hidden, params,
                                 rnn_hidden_dim=rnn_hidden_dim,
                                 n_actions=n_actions)
    assert q.shape == (B, n_actions) and h.shape == (B, rnn_hidden_dim)
    assert jnp.allclose(q, q_ref, atol=1e-4, rtol=1e-4), "q mismatch vs reference"
    assert jnp.allclose(h, h_ref, atol=1e-4, rtol=1e-4), "h mismatch vs reference"

    print("KERNEL_OK")
</pallas_src>

<mosaic_0001>
module attributes {stable_mosaic.version = 11 : i64} {
  func.func @_rnn_kernel(%arg0: i32, %arg1: memref<8x128xf32, #tpu.memory_space<vmem>>, %arg2: memref<8x128xf32, #tpu.memory_space<vmem>>, %arg3: memref<128x128xf32, #tpu.memory_space<vmem>>, %arg4: memref<1x128xf32, #tpu.memory_space<vmem>>, %arg5: memref<256x256xf32, #tpu.memory_space<vmem>>, %arg6: memref<1x256xf32, #tpu.memory_space<vmem>>, %arg7: memref<128x128xf32, #tpu.memory_space<vmem>>, %arg8: memref<1x128xf32, #tpu.memory_space<vmem>>, %arg9: memref<128x128xf32, #tpu.memory_space<vmem>>, %arg10: memref<1x128xf32, #tpu.memory_space<vmem>>, %arg11: memref<128x128xf32, #tpu.memory_space<vmem>>, %arg12: memref<1x128xf32, #tpu.memory_space<vmem>>, %arg13: memref<8x128xf32, #tpu.memory_space<vmem>>, %arg14: memref<8x128xf32, #tpu.memory_space<vmem>>) attributes {dimension_semantics = [#tpu.dimension_semantics<parallel>], iteration_bounds = array<i64: 2>, scalar_prefetch = 0 : i64, scratch_operands = 0 : i64, tpu.core_type = #tpu.core_type<tc>, window_params = [{transform_indices = @transform_0, window_bounds = array<i64: 8, 128>}, {transform_indices = @transform_1, window_bounds = array<i64: 8, 128>}, {pipeline_mode = #tpu.pipeline_mode<synchronous>, transform_indices = @transform_2, window_bounds = array<i64: 128, 128>}, {pipeline_mode = #tpu.pipeline_mode<synchronous>, transform_indices = @transform_3, window_bounds = array<i64: 1, 128>}, {pipeline_mode = #tpu.pipeline_mode<synchronous>, transform_indices = @transform_4, window_bounds = array<i64: 256, 256>}, {pipeline_mode = #tpu.pipeline_mode<synchronous>, transform_indices = @transform_5, window_bounds = array<i64: 1, 256>}, {pipeline_mode = #tpu.pipeline_mode<synchronous>, transform_indices = @transform_6, window_bounds = array<i64: 128, 128>}, {pipeline_mode = #tpu.pipeline_mode<synchronous>, transform_indices = @transform_7, window_bounds = array<i64: 1, 128>}, {pipeline_mode = #tpu.pipeline_mode<synchronous>, transform_indices = @transform_8, window_bounds = array<i64: 128, 128>}, {pipeline_mode = #tpu.pipeline_mode<synchronous>, transform_indices = @transform_9, window_bounds = array<i64: 1, 128>}, {pipeline_mode = #tpu.pipeline_mode<synchronous>, transform_indices = @transform_10, window_bounds = array<i64: 128, 128>}, {pipeline_mode = #tpu.pipeline_mode<synchronous>, transform_indices = @transform_11, window_bounds = array<i64: 1, 128>}, {transform_indices = @transform_12, window_bounds = array<i64: 8, 128>}, {transform_indices = @transform_13, window_bounds = array<i64: 8, 128>}]} {
    %c0 = arith.constant 0 : index
    %c0_0 = arith.constant 0 : index
    %0 = vector.load %arg3[%c0, %c0_0] : memref<128x128xf32, #tpu.memory_space<vmem>>, vector<128x128xf32>
    %c0_1 = arith.constant 0 : index
    %c0_2 = arith.constant 0 : index
    %1 = vector.load %arg5[%c0_1, %c0_2] : memref<256x256xf32, #tpu.memory_space<vmem>>, vector<256x256xf32>
    %c0_3 = arith.constant 0 : index
    %c0_4 = arith.constant 0 : index
    %2 = vector.load %arg7[%c0_3, %c0_4] : memref<128x128xf32, #tpu.memory_space<vmem>>, vector<128x128xf32>
    %c0_5 = arith.constant 0 : index
    %c0_6 = arith.constant 0 : index
    %3 = vector.load %arg9[%c0_5, %c0_6] : memref<128x128xf32, #tpu.memory_space<vmem>>, vector<128x128xf32>
    %c0_7 = arith.constant 0 : index
    %c0_8 = arith.constant 0 : index
    %4 = vector.load %arg11[%c0_7, %c0_8] : memref<128x128xf32, #tpu.memory_space<vmem>>, vector<128x128xf32>
    %c0_9 = arith.constant 0 : index
    %c0_10 = arith.constant 0 : index
    %5 = vector.load %arg1[%c0_9, %c0_10] : memref<8x128xf32, #tpu.memory_space<vmem>>, vector<8x128xf32>
    %c0_11 = arith.constant 0 : index
    %c0_12 = arith.constant 0 : index
    %6 = vector.load %arg2[%c0_11, %c0_12] : memref<8x128xf32, #tpu.memory_space<vmem>>, vector<8x128xf32>
    %cst = arith.constant dense<0.000000e+00> : vector<8x128xf32>
    %7 = tpu.matmul %5, %0, %cst {dimension_numbers = #tpu.dot_dimension_numbers<[1], [0], [0], [1], [0, 0, 1, 1], [], []>} : vector<8x128xf32>, vector<128x128xf32>, vector<8x128xf32> -> vector<8x128xf32>
    %c0_13 = arith.constant 0 : index
    %c0_14 = arith.constant 0 : index
    %8 = vector.load %arg4[%c0_13, %c0_14] : memref<1x128xf32, #tpu.memory_space<vmem>>, vector<1x128xf32>
    %9 = vector.broadcast %8 : vector<1x128xf32> to vector<8x128xf32>
    %10 = arith.addf %7, %9 : vector<8x128xf32>
    %cst_15 = arith.constant 0.000000e+00 : f32
    %11 = vector.broadcast %cst_15 : f32 to vector<8x128xf32>
    %12 = arith.maximumf %10, %11 : vector<8x128xf32>
    %13 = tpu.concatenate %12, %6 in 1 : vector<8x128xf32>, vector<8x128xf32> -> vector<8x256xf32>
    %cst_16 = arith.constant dense<0.000000e+00> : vector<8x256xf32>
    %14 = tpu.matmul %13, %1, %cst_16 {dimension_numbers = #tpu.dot_dimension_numbers<[1], [0], [0], [1], [0, 0, 1, 1], [], []>} : vector<8x256xf32>, vector<256x256xf32>, vector<8x256xf32> -> vector<8x256xf32>
    %c0_17 = arith.constant 0 : index
    %c0_18 = arith.constant 0 : index
    %15 = vector.load %arg6[%c0_17, %c0_18] : memref<1x256xf32, #tpu.memory_space<vmem>>, vector<1x256xf32>
    %16 = vector.broadcast %15 : vector<1x256xf32> to vector<8x256xf32>
    %17 = arith.addf %14, %16 : vector<8x256xf32>
    %18 = vector.extract_strided_slice %17 {offsets = [0, 0], sizes = [8, 128], strides = [1, 1]} : vector<8x256xf32> to vector<8x128xf32>
    %19 = arith.negf %18 : vector<8x128xf32>
    %20 = math.exp %19 : vector<8x128xf32>
    %cst_19 = arith.constant 1.000000e+00 : f32
    %21 = vector.broadcast %cst_19 : f32 to vector<8x128xf32>
    %22 = arith.addf %21, %20 : vector<8x128xf32>
    %23 = arith.divf %21, %22 : vector<8x128xf32>
    %24 = vector.extract_strided_slice %17 {offsets = [0, 128], sizes = [8, 128], strides = [1, 1]} : vector<8x256xf32> to vector<8x128xf32>
    %25 = arith.negf %24 : vector<8x128xf32>
    %26 = math.exp %25 : vector<8x128xf32>
    %cst_20 = arith.constant 1.000000e+00 : f32
    %27 = vector.broadcast %cst_20 : f32 to vector<8x128xf32>
    %28 = arith.addf %27, %26 : vector<8x128xf32>
    %29 = arith.divf %27, %28 : vector<8x128xf32>
    %cst_21 = arith.constant dense<0.000000e+00> : vector<8x128xf32>
    %30 = tpu.matmul %12, %2, %cst_21 {dimension_numbers = #tpu.dot_dimension_numbers<[1], [0], [0], [1], [0, 0, 1, 1], [], []>} : vector<8x128xf32>, vector<128x128xf32>, vector<8x128xf32> -> vector<8x128xf32>
    %c0_22 = arith.constant 0 : index
    %c0_23 = arith.constant 0 : index
    %31 = vector.load %arg8[%c0_22, %c0_23] : memref<1x128xf32, #tpu.memory_space<vmem>>, vector<1x128xf32>
    %32 = vector.broadcast %31 : vector<1x128xf32> to vector<8x128xf32>
    %33 = arith.addf %30, %32 : vector<8x128xf32>
    %cst_24 = arith.constant dense<0.000000e+00> : vector<8x128xf32>
    %34 = tpu.matmul %6, %3, %cst_24 {dimension_numbers = #tpu.dot_dimension_numbers<[1], [0], [0], [1], [0, 0, 1, 1], [], []>} : vector<8x128xf32>, vector<128x128xf32>, vector<8x128xf32> -> vector<8x128xf32>
    %c0_25 = arith.constant 0 : index
    %c0_26 = arith.constant 0 : index
    %35 = vector.load %arg10[%c0_25, %c0_26] : memref<1x128xf32, #tpu.memory_space<vmem>>, vector<1x128xf32>
    %36 = vector.broadcast %35 : vector<1x128xf32> to vector<8x128xf32>
    %37 = arith.addf %34, %36 : vector<8x128xf32>
    %38 = arith.mulf %23, %37 : vector<8x128xf32>
    %39 = arith.addf %33, %38 : vector<8x128xf32>
    %40 = math.tanh %39 : vector<8x128xf32>
    %cst_27 = arith.constant 1.000000e+00 : f32
    %41 = vector.broadcast %cst_27 : f32 to vector<8x128xf32>
    %42 = arith.subf %41, %29 : vector<8x128xf32>
    %43 = arith.mulf %42, %40 : vector<8x128xf32>
    %44 = arith.mulf %29, %6 : vector<8x128xf32>
    %45 = arith.addf %43, %44 : vector<8x128xf32>
    %c0_28 = arith.constant 0 : index
    %c0_29 = arith.constant 0 : index
    %46 = vector.load %arg14[%c0_28, %c0_29] : memref<8x128xf32, #tpu.memory_space<vmem>>, vector<8x128xf32>
    tpu.vector_store %arg14[%c0_28, %c0_29], %45 {strides = array<i32>} : memref<8x128xf32, #tpu.memory_space<vmem>>, vector<8x128xf32>,
    %cst_30 = arith.constant dense<0.000000e+00> : vector<8x128xf32>
    %47 = tpu.matmul %45, %4, %cst_30 {dimension_numbers = #tpu.dot_dimension_numbers<[1], [0], [0], [1], [0, 0, 1, 1], [], []>} : vector<8x128xf32>, vector<128x128xf32>, vector<8x128xf32> -> vector<8x128xf32>
    %c0_31 = arith.constant 0 : index
    %c0_32 = arith.constant 0 : index
    %48 = vector.load %arg12[%c0_31, %c0_32] : memref<1x128xf32, #tpu.memory_space<vmem>>, vector<1x128xf32>
    %49 = vector.broadcast %48 : vector<1x128xf32> to vector<8x128xf32>
    %50 = arith.addf %47, %49 : vector<8x128xf32>
    %c0_33 = arith.constant 0 : index
    %c0_34 = arith.constant 0 : index
    %51 = vector.load %arg13[%c0_33, %c0_34] : memref<8x128xf32, #tpu.memory_space<vmem>>, vector<8x128xf32>
    tpu.vector_store %arg13[%c0_33, %c0_34], %50 {strides = array<i32>} : memref<8x128xf32, #tpu.memory_space<vmem>>, vector<8x128xf32>,
    return
  }
  func.func @transform_0(%arg0: i32) -> (i32, i32) {
    %c0_i32 = arith.constant 0 : i32
    %c0_i32_0 = arith.constant 0 : i32
    return %arg0, %c0_i32 : i32, i32
  }
  func.func @transform_1(%arg0: i32) -> (i32, i32) {
    %c0_i32 = arith.constant 0 : i32
    %c0_i32_0 = arith.constant 0 : i32
    return %arg0, %c0_i32 : i32, i32
  }
  func.func @transform_2(%arg0: i32) -> (i32, i32) {
    %c0_i32 = arith.constant 0 : i32
    %c0_i32_0 = arith.constant 0 : i32
    %c0_i32_1 = arith.constant 0 : i32
    return %c0_i32, %c0_i32_0 : i32, i32
  }
  func.func @transform_3(%arg0: i32) -> (i32, i32) {
    %c0_i32 = arith.constant 0 : i32
    %c0_i32_0 = arith.constant 0 : i32
    %c0_i32_1 = arith.constant 0 : i32
    return %c0_i32, %c0_i32_0 : i32, i32
  }
  func.func @transform_4(%arg0: i32) -> (i32, i32) {
    %c0_i32 = arith.constant 0 : i32
    %c0_i32_0 = arith.constant 0 : i32
    %c0_i32_1 = arith.constant 0 : i32
    return %c0_i32, %c0_i32_0 : i32, i32
  }
  func.func @transform_5(%arg0: i32) -> (i32, i32) {
    %c0_i32 = arith.constant 0 : i32
    %c0_i32_0 = arith.constant 0 : i32
    %c0_i32_1 = arith.constant 0 : i32
    return %c0_i32, %c0_i32_0 : i32, i32
  }
  func.func @transform_6(%arg0: i32) -> (i32, i32) {
    %c0_i32 = arith.constant 0 : i32
    %c0_i32_0 = arith.constant 0 : i32
    %c0_i32_1 = arith.constant 0 : i32
    return %c0_i32, %c0_i32_0 : i32, i32
  }
  func.func @transform_7(%arg0: i32) -> (i32, i32) {
    %c0_i32 = arith.constant 0 : i32
    %c0_i32_0 = arith.constant 0 : i32
    %c0_i32_1 = arith.constant 0 : i32
    return %c0_i32, %c0_i32_0 : i32, i32
  }
  func.func @transform_8(%arg0: i32) -> (i32, i32) {
    %c0_i32 = arith.constant 0 : i32
    %c0_i32_0 = arith.constant 0 : i32
    %c0_i32_1 = arith.constant 0 : i32
    return %c0_i32, %c0_i32_0 : i32, i32
  }
  func.func @transform_9(%arg0: i32) -> (i32, i32) {
    %c0_i32 = arith.constant 0 : i32
    %c0_i32_0 = arith.constant 0 : i32
    %c0_i32_1 = arith.constant 0 : i32
    return %c0_i32, %c0_i32_0 : i32, i32
  }
  func.func @transform_10(%arg0: i32) -> (i32, i32) {
    %c0_i32 = arith.constant 0 : i32
    %c0_i32_0 = arith.constant 0 : i32
    %c0_i32_1 = arith.constant 0 : i32
    return %c0_i32, %c0_i32_0 : i32, i32
  }
  func.func @transform_11(%arg0: i32) -> (i32, i32) {
    %c0_i32 = arith.constant 0 : i32
    %c0_i32_0 = arith.constant 0 : i32
    %c0_i32_1 = arith.constant 0 : i32
    return %c0_i32, %c0_i32_0 : i32, i32
  }
  func.func @transform_12(%arg0: i32) -> (i32, i32) {
    %c0_i32 = arith.constant 0 : i32
    %c0_i32_0 = arith.constant 0 : i32
    return %arg0, %c0_i32 : i32, i32
  }
  func.func @transform_13(%arg0: i32) -> (i32, i32) {
    %c0_i32 = arith.constant 0 : i32
    %c0_i32_0 = arith.constant 0 : i32
    return %arg0, %c0_i32 : i32, i32
  }
}

</mosaic_0001>

<bundles_post_ra>
// kernel: tpu_custom_call.1
= control target key start
LH: loop header
LB: loop body
LE: loop exit
PB: predicated region body
PF: predicated region fallthrough
CT: control target
= control target key end

     0   :  { %s2454_s0 = inlined_call_operand.hbm [shape: f32[16,128], index: 0, kind: input, shape index: {}]   ;;  %s2455_s1 = inlined_call_operand.hbm [shape: f32[16,128], index: 1, kind: input, shape index: {}]   ;;  %s2456_s2 = inlined_call_operand.hbm [shape: f32[128,128], index: 2, kind: input, shape index: {}]   ;;  %s2457_s3 = inlined_call_operand.vmem [shape: f32[1,128], index: 3, kind: input, shape index: {}]   ;;  %s2458_s4 = inlined_call_operand.hbm [shape: f32[256,256], index: 4, kind: input, shape index: {}]   ;;  %s2459_s5 = inlined_call_operand.vmem [shape: f32[1,256], index: 5, kind: input, shape index: {}]   ;;  %s2460_s6 = inlined_call_operand.hbm [shape: f32[128,128], index: 6, kind: input, shape index: {}]   ;;  %s2461_s7 = inlined_call_operand.vmem [shape: f32[1,128], index: 7, kind: input, shape index: {}]   ;;  %s2462_s8 = inlined_call_operand.hbm [shape: f32[128,128], index: 8, kind: input, shape index: {}]   ;;  %s2463_s9 = inlined_call_operand.vmem [shape: f32[1,128], index: 9, kind: input, shape index: {}]   ;;  %s2464_s10 = inlined_call_operand.hbm [shape: f32[128,128], index: 10, kind: input, shape index: {}]   ;;  %s2465_s11 = inlined_call_operand.vmem [shape: f32[1,128], index: 11, kind: input, shape index: {}]   ;;  %s2466_s12 = inlined_call_operand.hbm [shape: f32[16,128], index: 12, kind: output, shape index: {0}]   ;;  %s2467_s13 = inlined_call_operand.hbm [shape: f32[16,128], index: 13, kind: output, shape index: {1}]  }
   0x1   :  { %2477 = sst [smem:[#allocation28_spill]] %s2456_s2 }
   0x2   :  { %2478 = sst [smem:[#allocation29_spill]] %s2458_s4 }
   0x3   :  { %2479 = sst [smem:[#allocation30_spill]] %s2460_s6 }
   0x4   :  { %2480 = sst [smem:[#allocation31_spill]] %s2462_s8 }
   0x5   :  { %2481 = sst [smem:[#allocation32_spill]] %s2464_s10 }
   0x6   :  { %2482 = sst [smem:[#allocation33_spill]] %s2466_s12 }
   0x7   :  { %19 = vsyncpa [#allocation3], 0 }
   0x8   :  { %21 = vsyncpa [#allocation3 + $0x1], 0 }
   0x9   :  { %22 = vsyncpa [#allocation6], 0 }
   0xa   :  { %24 = vsyncpa [#allocation6 + $0x1], 0 }
   0xb   :  { %25 = vsyncpa [#allocation9], 0 }
   0xc   :  { %26 = vsyncpa [#allocation12], 0 }
   0xd   :  { %27 = vsyncpa [#allocation4], 0 }
   0xe   :  { %29 = vsyncpa [#allocation4 + $0x1], 0 }
   0xf   :  { %30 = vsyncpa [#allocation16], 0 }
  0x10   :  { %32 = vsyncpa [#allocation16 + $0x1], 0  ;;  %s2071_s25 = smov 0   ;;  %s2073_s26 = smov 0  }
  0x11   :  { %s2075_s27 = smov 0   ;;  %s2077_s28 = smov 0  }
  0x12 LB: > { %2483 = sst [smem:[#allocation24_spill]] %s1980_s27  ;;  %s1986_s29 = smov [#allocation7]   ;;  %s1984_s28 = sphi %s2077_s28, %s2512_s28   ;;  %s1980_s27 = sphi %s2075_s27, %s2514_s27   ;;  %s1976_s26 = sphi %s2073_s26, %s2516_s26   ;;  %s1972_s25 = sphi %s2071_s25, %s2515_s25  }
  0x13   : > { %s369_s30 = sshll.u32 %s1986_s29, 4  ;;  %s2092_s14 = sadd.s32 4294967295, %s1984_s28   ;;  %s370_s30 = int_to_ptr.vmem [resolvable:$true] %s369_s30 }
  0x14   : > { %p1324_p0 = scmp.ge.s32.totalorder %s1984_s28, 1  ;;  %p2473_p1 = scmp.eq.s32.totalorder %s2092_s14, 0 }
  0x15   : > { %p357_p2 = scmp.lt.s32.totalorder %s1984_s28, 3  ;;  %s1987_s16 = smov [#allocation8]  }
  0x16   : > { %s385_s17 = sshll.u32 %s1987_s16, 4  ;;  %s1988_s19 = smov [#allocation11]   ;;  %s2110_s17 = int_to_ptr.vmem [resolvable:$true] %s385_s17 }
  0x17   : > { %p2097_p3 = pnand %p1324_p0, %p357_p2  ;;  %s2112_s20 = sshll.u32 %s1988_s19, 4  ;;  %s418_s20 = int_to_ptr.vmem [resolvable:$true] %s2112_s20 }
  0x18   : > { %s1699_s22 = scalar_lea.vmem %s370_s30, 2048  ;;  %p1707_p11 = scmp.lt.s32.totalorder %s370_s30, %s370_s30 }
  0x19   : > { %s2484_s15 = scalar_select %p2097_p3, 1, 0 }
  0x1a   : > { %p1593_p5 = pneg %p2097_p3  ;;  %p1700_p8 = scmp.ne.s32.totalorder %s370_s30, %s1699_s22 }
  0x1b   : > { %p1708_p12 = scmp.lt.s32.totalorder %s1699_s22, %s1699_s22 }
  0x1c   : > { %p2106_p6 = pnand %p1593_p5, %p2473_p1 }
  0x1d   : > { %p1709_p13 = por %p1708_p12, %p1707_p11 }
  0x1e   : > { %p2116_p7 = pneg %p2106_p6 }
  0x20   : > { %p1702_p9 = pnand %p1700_p8, %p2116_p7 }
  0x22   : > { %p1703_p10 = pneg %p1702_p9 }
  0x24   : > { %p1710_p0 = pnand %p1709_p13, %p1703_p10 }
  0x26   : > { %1713 = shalt.err (!%p1710_p0)
}
  0x27   : > { %s1989_s23 = smov 128   ;;  %s1990_s24 = smov 8  }
  0x28   : > { %s2487_s2 = sld [smem:[#allocation28_spill]]  ;;  %s1725_s19 = scalar_lea.vmem %s2110_s17, 8192 }
  0x29   : > { %p1726_p2 = scmp.ne.s32.totalorder %s2110_s17, %s1725_s19  ;;  %p1733_p9 = scmp.lt.s32.totalorder %s2110_s17, %s2110_s17 }
  0x2a   : > { %p1734_p10 = scmp.lt.s32.totalorder %s1725_s19, %s1725_s19 }
  0x2b   : > { %p1728_p5 = pnand %p1726_p2, %p2116_p7 }
  0x2c   : > { %p1735_p11 = por %p1734_p10, %p1733_p9 }
  0x2d   : > { %p1729_p8 = pneg %p1728_p5 }
  0x2e   : > { %1596 = dma.hbm_to_vmem [thread:$0]  (!%p2106_p6), %s2487_s2, 2048, %s370_s30, [#allocation6], %s1989_s23, %s1989_s23, %s1990_s24  }
  0x2f   : > { %p1736_p12 = pnand %p1735_p11, %p1729_p8 }
  0x31   : > { %1739 = shalt.err (!%p1736_p12)
}
  0x32   : > { %s1991_s22 = smov 256   ;;  %s1992_s12 = smov 16  }
  0x33   : > { %s2488_s4 = sld [smem:[#allocation29_spill]]  ;;  %s1751_s16 = scalar_lea.vmem %s418_s20, 2048 }
  0x34   : > { %p1752_p13 = scmp.ne.s32.totalorder %s418_s20, %s1751_s16  ;;  %p1759_p5 = scmp.lt.s32.totalorder %s418_s20, %s418_s20 }
  0x35   : > { %p1760_p8 = scmp.lt.s32.totalorder %s1751_s16, %s1751_s16 }
  0x36   : > { %p1754_p0 = pnand %p1752_p13, %p2116_p7 }
  0x37   : > { %p1761_p9 = por %p1760_p8, %p1759_p5 }
  0x38   : > { %p1755_p2 = pneg %p1754_p0 }
  0x39   : > { %1599 = dma.hbm_to_vmem [thread:$0]  (!%p2106_p6), %s2488_s4, 8192, %s2110_s17, [#allocation9], %s1991_s22, %s1991_s22, %s1992_s12  }
  0x3a   : > { %p1762_p10 = pnand %p1761_p9, %p1755_p2 }
  0x3c   : > { %1765 = shalt.err (!%p1762_p10)
}
  0x3d   : > { %s2489_s8 = sld [smem:[#allocation31_spill]]  ;;  %s1993_s12 = smov [#allocation10]  }
  0x3e   : > { %s401_s17 = sshll.u32 %s1993_s12, 4  ;;  %s1994_s22 = smov [#allocation13]   ;;  %s402_s17 = int_to_ptr.vmem [resolvable:$true] %s401_s17 }
  0x3f   : > { %s433_s29 = sshll.u32 %s1994_s22, 4  ;;  %s1777_s30 = scalar_lea.vmem %s402_s17, 2048  ;;  %s434_s29 = int_to_ptr.vmem [resolvable:$true] %s433_s29 }
  0x40   : > { %p1778_p11 = scmp.ne.s32.totalorder %s402_s17, %s1777_s30  ;;  %p1785_p0 = scmp.lt.s32.totalorder %s402_s17, %s402_s17 }
  0x41   : > { %p1786_p2 = scmp.lt.s32.totalorder %s1777_s30, %s1777_s30 }
  0x42   : > { %p1780_p12 = pnand %p1778_p11, %p2116_p7 }
  0x43   : > { %1605 = dma.hbm_to_vmem [thread:$0]  (!%p2106_p6), %s2489_s8, 2048, %s418_s20, [#allocation12], %s1989_s23, %s1989_s23, %s1990_s24  }
  0x44   : > { %p1781_p13 = pneg %p1780_p12  ;;  %p1787_p5 = por %p1786_p2, %p1785_p0 }
  0x46   : > { %p1788_p8 = pnand %p1787_p5, %p1781_p13 }
  0x48   : > { %1791 = shalt.err (!%p1788_p8)
}
  0x49   : > { %s2490_s6 = sld [smem:[#allocation30_spill]]  ;;  %s1803_s16 = scalar_lea.vmem %s434_s29, 2048 }
  0x4a   : > { %p1804_p9 = scmp.ne.s32.totalorder %s434_s29, %s1803_s16  ;;  %p1811_p12 = scmp.lt.s32.totalorder %s434_s29, %s434_s29 }
  0x4b   : > { %p1812_p0 = scmp.lt.s32.totalorder %s1803_s16, %s1803_s16 }
  0x4c   : > { %p1806_p10 = pnand %p1804_p9, %p2116_p7 }
  0x4d   : > { %p1813_p13 = por %p1812_p0, %p1811_p12 }
  0x4e   : > { %p1807_p11 = pneg %p1806_p10 }
  0x4f   : > { %1602 = dma.hbm_to_vmem [thread:$0]  (!%p2106_p6), %s2490_s6, 2048, %s402_s17, [#allocation9], %s1989_s23, %s1989_s23, %s1990_s24  }
  0x50   : > { %p1814_p2 = pnand %p1813_p13, %p1807_p11 }
  0x52   : > { %1817 = shalt.err (!%p1814_p2)
}
  0x53   : > { %s2491_s10 = sld [smem:[#allocation32_spill]]  ;;  %s1323_s18 = sadd.s32 4294967294, %s1984_s28  }
  0x54   : > { %s2175_s21 = sadd.s32 1, %s1984_s28   ;;  %s45_s17 = sadd.s32 1, %s1980_s27 }
  0x55   : > { %2492 = sst [smem:[#allocation25_spill]] %s2175_s21  ;;  %s42_s22 = ssub.s32 %s1984_s28, %s2175_s21 }
  0x56   : > { %p52_p7 = scmp.ne.s32.totalorder %s1980_s27, %s1976_s26  ;;  %p43_p5 = scmp.eq.s32.totalorder %s42_s22, 0 }
  0x57   : > { %p53_p8 = scmp.eq.s32.totalorder %s1984_s28, 0  ;;  %p58_p9 = scmp.ne.s32.totalorder %s1976_s26, %s1972_s25 }
  0x58   : > { %p318_p10 = scmp.eq.s32.totalorder %s2092_s14, 1  ;;  %p324_p0 = scmp.eq.s32.totalorder %s1323_s18, 1 }
  0x59   : > { %1608 = dma.hbm_to_vmem [thread:$0]  (!%p2106_p6), %s2491_s10, 2048, %s434_s29, [#allocation12], %s1989_s23, %s1989_s23, %s1990_s24  }
  0x5a   : > { %s2187_s30 = scalar_select %p43_p5, %s1980_s27, %s45_s17  }
  0x5b   : > { %p54_p11 = por %p53_p8, %p52_p7  ;;  %p2191_p12 = por %p2473_p1, %p58_p9 }
  0x5c   : > { %2493 = sst [smem:[#allocation26_spill]] %s2187_s30  ;;  %p2195_p6 = por %p318_p10, %p52_p7 }
  0x5d   : > { %s2494_s2 = scalar_select %p2191_p12, 1, 0 }
  0x5e   : > { %s2495_s23 = scalar_select %p2195_p6, 1, 0 }
  0x5f   : > { %p1628_p13 = scmp.lt.s32.totalorder %s1984_s28, 2  ;;  %s450_s24 = sand.u32 1, %s1980_s27  }
  0x60   : > { %p2201_p2 = por %p324_p0, %p58_p9  ;;  %s2205_s20 = sshll.u32 %s450_s24, 3 }
  0x61   : > { %s1332_s16 = sshll.u32 %s1984_s28, 7  ;;  %s454_s22 = scalar_lea.vmem [#allocation2], %s2205_s20 }
  0x62   : > { %s2496_s29 = scalar_select %p2201_p2, 1, 0 }
  0x63   : > { %s2211_s17 = scalar_lea.hbm %s2454_s0, %s1332_s16  ;;  %s461_s18 = sshll.u32 %s454_s22, 4  ;;  %s462_s18 = int_to_ptr.vmem [resolvable:$true] %s461_s18 }
  0x64   : > { %2497 = sst [smem:[#allocation27_spill]] %s2496_s29  ;;  %p2214_p7 = pnand %p1628_p13, %p54_p11 }
  0x65   : > { %s2221_s10 = scalar_lea.hbm %s2455_s1, %s1332_s16  ;;  %s451_s19 = scalar_lea.sflag [#allocation3], %s450_s24 }
  0x66   : > { %s1818_s12 = scalar_lea.hbm %s2211_s17, 128  ;;  %p1820_p8 = pneg %p2214_p7 }
  0x67   : > { %p1819_p5 = scmp.ne.s32.totalorder %s2211_s17, %s1818_s12  ;;  %s1823_s27 = scalar_lea.hbm %s2454_s0, 256 }
  0x68   : > { %p1824_p11 = scmp.lt.s32.totalorder %s2211_s17, %s2454_s0  ;;  %p1825_p0 = scmp.lt.s32.totalorder %s1823_s27, %s1818_s12 }
  0x69   : > { %p1821_p9 = pnand %p1820_p8, %p1819_p5 }
  0x6a   : > { %p1826_p13 = por %p1825_p0, %p1824_p11 }
  0x6b   : > { %p1822_p10 = pneg %p1821_p9 }
  0x6d   : > { %p1827_p4 = pnand %p1826_p13, %p1822_p10 }
  0x6f   : > { %1830 = shalt.err (!%p1827_p4)
}
  0x70   : > { %s1831_s6 = scalar_lea.vmem %s462_s18, 128  ;;  %s1995_s8 = smov [#allocation2]  }
  0x71   : > { %p1832_p1 = scmp.ne.s32.totalorder %s462_s18, %s1831_s6  ;;  %s1836_s24 = sshll.u32 %s1995_s8, 4  ;;  %s1837_s24 = int_to_ptr.vmem [resolvable:$false] %s1836_s24 }
  0x72   : > { %s1838_s30 = scalar_lea.vmem %s1837_s24, 256  ;;  %p1839_p9 = scmp.lt.s32.totalorder %s462_s18, %s1837_s24 }
  0x73   : > { %p1834_p2 = pnand %p1832_p1, %p1820_p8  ;;  %p1840_p6 = scmp.lt.s32.totalorder %s1838_s30, %s1831_s6 }
  0x75   : > { %p1835_p5 = pneg %p1834_p2  ;;  %p1841_p12 = por %p1840_p6, %p1839_p9 }
  0x77   : > { %p1842_p3 = pnand %p1841_p12, %p1835_p5 }
  0x79   : > { %1845 = shalt.err (!%p1842_p3)
}
  0x7a   : > { %1612 = dma.hbm_to_vmem [thread:$0]  (!%p2214_p7), %s2211_s17, 128, %s462_s18, %s451_s19  }
  0x7b   : > { %s468_s27 = sand.u32 1, %s1984_s28   ;;  %s472_s21 = scalar_lea.vmem [#allocation5], %s2205_s20 }
  0x7c   : > { %s479_s29 = sshll.u32 %s472_s21, 4  ;;  %s469_s16 = scalar_lea.sflag [#allocation6], %s468_s27  ;;  %s480_s29 = int_to_ptr.vmem [resolvable:$true] %s479_s29 }
  0x7d   : > { %s1846_s12 = scalar_lea.hbm %s2221_s10, 128  ;;  %s1851_s8 = scalar_lea.hbm %s2455_s1, 256 }
  0x7e   : > { %p1847_p1 = scmp.ne.s32.totalorder %s2221_s10, %s1846_s12  ;;  %p1852_p12 = scmp.lt.s32.totalorder %s2221_s10, %s2455_s1 }
  0x7f   : > { %p1853_p6 = scmp.lt.s32.totalorder %s1851_s8, %s1846_s12 }
  0x80   : > { %p1849_p3 = pnand %p1847_p1, %p1820_p8 }
  0x81   : > { %p1854_p2 = por %p1853_p6, %p1852_p12 }
  0x82   : > { %p1850_p4 = pneg %p1849_p3 }
  0x84   : > { %p1855_p10 = pnand %p1854_p2, %p1850_p4 }
  0x86   : > { %1858 = shalt.err (!%p1855_p10)
}
  0x87   : > { %s1859_s20 = scalar_lea.vmem %s480_s29, 128  ;;  %s1996_s17 = smov [#allocation5]  }
  0x88   : > { %p1860_p11 = scmp.ne.s32.totalorder %s480_s29, %s1859_s20  ;;  %s1864_s18 = sshll.u32 %s1996_s17, 4  ;;  %s1865_s18 = int_to_ptr.vmem [resolvable:$false] %s1864_s18 }
  0x89   : > { %s1866_s19 = scalar_lea.vmem %s1865_s18, 256  ;;  %p1867_p5 = scmp.lt.s32.totalorder %s480_s29, %s1865_s18 }
  0x8a   : > { %p1862_p0 = pnand %p1860_p11, %p1820_p8  ;;  %p1868_p9 = scmp.lt.s32.totalorder %s1866_s19, %s1859_s20 }
  0x8c   : > { %p1863_p13 = pneg %p1862_p0  ;;  %p1869_p1 = por %p1868_p9, %p1867_p5 }
  0x8e   : > { %p1870_p3 = pnand %p1869_p1, %p1863_p13 }
  0x90   : > { %1873 = shalt.err (!%p1870_p3)
}
  0x91   : > { %1615 = dma.hbm_to_vmem [thread:$0]  (!%p2214_p7), %s2221_s10, 128, %s480_s29, %s469_s16  }
  0x92   : > { %p2499_p4 = scmp.ne.s32.totalorder %s2484_s15, 0 }
  0x93   : > { %s2266_s27 = sand.u32 (!%p2499_p4), 1, %s1976_s26   ;;  %p2500_p8 = scmp.ne.s32.totalorder (!%p2499_p4), %s2494_s2, 0 }
  0x94   : > { %488 = sbr.rel (%p2499_p4) target bundleno = 854 (0x356), region = 68  ;;  %s2269_s21 = sshll.u32 (!%p2499_p4), %s2266_s27, 3 }
  0x95   : > { %s491_s12 = scalar_lea.sflag (!%p2499_p4), [#allocation3], %s2266_s27  ;;  %s494_s22 = scalar_lea.vmem (!%p2499_p4), [#allocation2], %s2269_s21 }
  0x99   : > { %1943 = dma.done.wait (%p2500_p8), %s491_s12, 128  }
  0x9a   : > { %1945 = vsyncadd (%p2500_p8), %s491_s12, 4294967168  ;;  %s499_s4 = sand.u32 1, %s2092_s14   ;;  %s503_s15 = scalar_lea.vmem [#allocation5], %s2269_s21 }
  0x9b   : > { %s500_s10 = scalar_lea.sflag [#allocation6], %s499_s4 }
  0x9c   : > { %1947 = dma.done.wait (%p2500_p8), %s500_s10, 128  }
  0x9d   : > { %1949 = vsyncadd (%p2500_p8), %s500_s10, 4294967168  ;;  %p2501_p7 = scmp.eq.s32.totalorder %s2092_s14, 0 }
  0x9f   : > { %1951 = dma.done.wait (%p2501_p7), [#allocation6], 2048   ;;  %p2502_p12 = pmov %p2501_p7 }
  0xa0   : > { %p2503_p6 = pmov %p2501_p7 }
  0xa1   : > { %1953 = vsyncadd (%p2502_p12), [#allocation6], 4294965248 }
  0xa2   : > { %1955 = dma.done.wait (%p2503_p6), [#allocation9], 10240   ;;  %p2504_p2 = pmov %p2503_p6 }
  0xa4   : > { %1957 = vsyncadd (%p2504_p2), [#allocation9], 4294957056  ;;  %p2505_p10 = pmov %p2504_p2 }
  0xa5   : > { %p2506_p11 = pmov %p2504_p2 }
  0xa6   : > { %1959 = dma.done.wait (%p2505_p10), [#allocation12], 4096  }
  0xa7   : > { %1961 = vsyncadd (%p2506_p11), [#allocation12], 4294963200  ;;  %v1997_v0 = vmov 0.0   ;;  %vm1998_vm0 = vmmov 0   ;;  %v591_v1 = vld [vmem:[#allocation7 + $0x78] sm:$0xff]  ;;  %v590_v2 = vld [vmem:[#allocation7 + $0x70] sm:$0xff] }
  0xa8   : > { %1425 = vmatprep.subr.mxu0 %v1997_v0  ;;  %1457 = vmatprep.mubr.msk.f32.mxu0 %vm1998_vm0, %v1997_v0  ;;  %v589_v3 = vld [vmem:[#allocation7 + $0x68] sm:$0xff]  ;;  %v588_v4 = vld [vmem:[#allocation7 + $0x60] sm:$0xff]  ;;  %v587_v5 = vld [vmem:[#allocation7 + $0x58] sm:$0xff]  ;;  %s575_s17 = scalar_lea.vmem [#allocation15], %s2269_s21  ;;  %s1353_s18 = sshll.u32 %s2092_s14, 7 }
  0xa9   : > { %1426 = vmatpush3.msra.mxu0 %v591_v1  ;;  %v623_v6 = vld [vmem:[#allocation8 + $0xf8] sm:$0xff]  ;;  %v622_v7 = vld [vmem:[#allocation8 + $0xf0] sm:$0xff]  ;;  %v621_v8 = vld [vmem:[#allocation8 + $0xe8] sm:$0xff]  ;;  %s1151_s4 = sshll.u32 %s575_s17, 4  ;;  %s1125_s10 = scalar_lea.sflag [#allocation16], %s2266_s27  ;;  %s1152_s4 = int_to_ptr.vmem [resolvable:$true] %s1151_s4 }
  0xaa   : > { %1427 = vmatprep.subr.mxu0 %v1997_v0  ;;  %796 = vmatprep.subr.mxu1 %v623_v6  ;;  %v620_v9 = vld [vmem:[#allocation8 + $0xe0] sm:$0xff]  ;;  %v619_v10 = vld [vmem:[#allocation8 + $0xd8] sm:$0xff]  ;;  %v586_v11 = vld [vmem:[#allocation7 + $0x50] sm:$0xff]  ;;  %p2507_p13 = scmp.ne.s32.totalorder %s2495_s23, 0  ;;  %s1999_s2 = smov [#allocation15]  }
  0xab   : > { %1428 = vmatpush3.msra.mxu0 %v590_v2  ;;  %797 = vmatpush1.msra.mxu1 %v622_v7  ;;  %v618_v12 = vld [vmem:[#allocation8 + $0xd0] sm:$0xff]  ;;  %v617_v13 = vld [vmem:[#allocation8 + $0xc8] sm:$0xff]  ;;  %v616_v15 = vld [vmem:[#allocation8 + $0xc0] sm:$0xff]  ;;  %s1878_s29 = sshll.u32 %s1999_s2, 4  ;;  %s1879_s29 = int_to_ptr.vmem [resolvable:$false] %s1878_s29 }
  0xac   : > { %1429 = vmatprep.subr.mxu0 %v1997_v0  ;;  %798 = vmatprep.subr.mxu1 %v621_v8  ;;  %v585_v14 = vld [vmem:[#allocation7 + $0x48] sm:$0xff]  ;;  %v615_v16 = vld [vmem:[#allocation8 + $0xb8] sm:$0xff]  ;;  %v584_v17 = vld [vmem:[#allocation7 + $0x40] sm:$0xff]  ;;  %s1880_s16 = scalar_lea.vmem %s1879_s29, 256  ;;  %p1881_p1 = scmp.lt.s32.totalorder %s1152_s4, %s1879_s29 }
  0xad   : > { %1430 = vmatpush3.msra.mxu0 %v589_v3  ;;  %799 = vmatpush1.msra.mxu1 %v620_v9  ;;  %v614_v18 = vld [vmem:[#allocation8 + $0xb0] sm:$0xff]  ;;  %v613_v19 = vld [vmem:[#allocation8 + $0xa8] sm:$0xff]  ;;  %v583_v20 = vld [vmem:[#allocation7 + $0x38] sm:$0xff] }
  0xae   : > { %1431 = vmatprep.subr.mxu0 %v1997_v0  ;;  %800 = vmatprep.subr.mxu1 %v619_v10  ;;  %v612_v21 = vld [vmem:[#allocation8 + $0xa0] sm:$0xff]  ;;  %v611_v22 = vld [vmem:[#allocation8 + $0x98] sm:$0xff]  ;;  %v582_v23 = vld [vmem:[#allocation7 + $0x30] sm:$0xff] }
  0xaf   : > { %1432 = vmatpush3.msra.mxu0 %v588_v4  ;;  %801 = vmatpush1.msra.mxu1 %v618_v12  ;;  %v610_v24 = vld [vmem:[#allocation8 + $0x90] sm:$0xff]  ;;  %v609_v25 = vld [vmem:[#allocation8 + $0x88] sm:$0xff]  ;;  %v608_v27 = vld [vmem:[#allocation8 + $0x80] sm:$0xff] }
  0xb0   : > { %1433 = vmatprep.subr.mxu0 %v1997_v0  ;;  %802 = vmatprep.subr.mxu1 %v617_v13  ;;  %v581_v26 = vld [vmem:[#allocation7 + $0x28] sm:$0xff]  ;;  %v607_v28 = vld [vmem:[#allocation8 + $0x78] sm:$0xff]  ;;  %v580_v29 = vld [vmem:[#allocation7 + $0x20] sm:$0xff] }
  0xb1   : > { %1434 = vmatpush3.msra.mxu0 %v587_v5  ;;  %803 = vmatpush1.msra.mxu1 %v616_v15  ;;  %v606_v30 = vld [vmem:[#allocation8 + $0x70] sm:$0xff]  ;;  %v605_v31 = vld [vmem:[#allocation8 + $0x68] sm:$0xff]  ;;  %v579_v32 = vld [vmem:[#allocation7 + $0x18] sm:$0xff] }
  0xb2   : > { %1435 = vmatprep.subr.mxu0 %v1997_v0  ;;  %804 = vmatprep.subr.mxu1 %v615_v16  ;;  %v604_v33 = vld [vmem:[#allocation8 + $0x60] sm:$0xff]  ;;  %v603_v34 = vld [vmem:[#allocation8 + $0x58] sm:$0xff]  ;;  %v578_v35 = vld [vmem:[#allocation7 + $0x10] sm:$0xff] }
  0xb3   : > { %1436 = vmatpush3.msra.mxu0 %v586_v11  ;;  %805 = vmatpush1.msra.mxu1 %v614_v18  ;;  %v602_v36 = vld [vmem:[#allocation8 + $0x50] sm:$0xff]  ;;  %v601_v37 = vld [vmem:[#allocation8 + $0x48] sm:$0xff]  ;;  %v600_v39 = vld [vmem:[#allocation8 + $0x40] sm:$0xff] }
  0xb4   : > { %1437 = vmatprep.subr.mxu0 %v1997_v0  ;;  %806 = vmatprep.subr.mxu1 %v613_v19  ;;  %v577_v38 = vld [vmem:[#allocation7 + $0x8] sm:$0xff]  ;;  %v599_v40 = vld [vmem:[#allocation8 + $0x38] sm:$0xff]  ;;  %v576_v41 = vld [vmem:[#allocation7] sm:$0xff] }
  0xb5   : > { %1438 = vmatpush3.msra.mxu0 %v585_v14  ;;  %807 = vmatpush1.msra.mxu1 %v612_v21  ;;  %v598_v42 = vld [vmem:[#allocation8 + $0x30] sm:$0xff]  ;;  %v704_v43 = vld [vmem:[%s494_s22] sm:$0xff]  ;;  %v595_v46 = vld [vmem:[#allocation8 + $0x18] sm:$0xff]  ;;  %s1149_s22 = scalar_lea.hbm %s2467_s13, %s1353_s18 }
  0xb6   : > { %1439 = vmatprep.subr.mxu0 %v1997_v0  ;;  %808 = vmatprep.subr.mxu1 %v611_v22  ;;  %v597_v44 = vld [vmem:[#allocation8 + $0x28] sm:$0xff]  ;;  %v596_v45 = vld [vmem:[#allocation8 + $0x20] sm:$0xff]  ;;  %v671_v47 = vld [vmem:[#allocation10 + $0x78] sm:$0xff] }
  0xb7   : > { %1440 = vmatpush3.msra.mxu0 %v584_v17  ;;  %809 = vmatpush1.msra.mxu1 %v610_v24  ;;  %v594_v48 = vld [vmem:[#allocation8 + $0x10] sm:$0xff]  ;;  %v593_v49 = vld [vmem:[#allocation8 + $0x8] sm:$0xff]  ;;  %v592_v51 = vld [vmem:[#allocation8] sm:$0xff] }
  0xb8   : > { %1441 = vmatprep.subr.mxu0 %v1997_v0  ;;  %810 = vmatprep.subr.mxu1 %v609_v25  ;;  %v670_v50 = vld [vmem:[#allocation10 + $0x70] sm:$0xff]  ;;  %v655_v52 = vld [vmem:[#allocation8 + $0x1f8] sm:$0xff]  ;;  %v669_v53 = vld [vmem:[#allocation10 + $0x68] sm:$0xff] }
  0xb9   : > { %1442 = vmatpush3.msra.mxu0 %v583_v20  ;;  %811 = vmatpush1.msra.mxu1 %v608_v27  ;;  %v654_v54 = vld [vmem:[#allocation8 + $0x1f0] sm:$0xff]  ;;  %v653_v55 = vld [vmem:[#allocation8 + $0x1e8] sm:$0xff]  ;;  %v668_v56 = vld [vmem:[#allocation10 + $0x60] sm:$0xff] }
  0xba   : > { %1443 = vmatprep.subr.mxu0 %v1997_v0  ;;  %812 = vmatprep.subr.mxu1 %v607_v28  ;;  %v652_v57 = vld [vmem:[#allocation8 + $0x1e0] sm:$0xff]  ;;  %v651_v58 = vld [vmem:[#allocation8 + $0x1d8] sm:$0xff]  ;;  %v650_v60 = vld [vmem:[#allocation8 + $0x1d0] sm:$0xff] }
  0xbb   : > { %1444 = vmatpush3.msra.mxu0 %v582_v23  ;;  %813 = vmatpush1.msra.mxu1 %v606_v30  ;;  %v667_v59 = vld [vmem:[#allocation10 + $0x58] sm:$0xff]  ;;  %v649_v61 = vld [vmem:[#allocation8 + $0x1c8] sm:$0xff]  ;;  %v666_v62 = vld [vmem:[#allocation10 + $0x50] sm:$0xff] }
  0xbc   : > { %1445 = vmatprep.subr.mxu0 %v1997_v0  ;;  %814 = vmatprep.subr.mxu1 %v605_v31  ;;  %v648_v63 = vld [vmem:[#allocation8 + $0x1c0] sm:$0xff]  ;;  %v647_v1 = vld [vmem:[#allocation8 + $0x1b8] sm:$0xff]  ;;  %v665_v2 = vld [vmem:[#allocation10 + $0x48] sm:$0xff] }
  0xbd   : > { %1446 = vmatpush3.msra.mxu0 %v581_v26  ;;  %815 = vmatpush1.msra.mxu1 %v604_v33  ;;  %v646_v3 = vld [vmem:[#allocation8 + $0x1b0] sm:$0xff]  ;;  %v645_v4 = vld [vmem:[#allocation8 + $0x1a8] sm:$0xff]  ;;  %v664_v5 = vld [vmem:[#allocation10 + $0x40] sm:$0xff] }
  0xbe   : > { %1447 = vmatprep.subr.mxu0 %v1997_v0  ;;  %816 = vmatprep.subr.mxu1 %v603_v34  ;;  %v644_v6 = vld [vmem:[#allocation8 + $0x1a0] sm:$0xff]  ;;  %v643_v7 = vld [vmem:[#allocation8 + $0x198] sm:$0xff]  ;;  %v642_v9 = vld [vmem:[#allocation8 + $0x190] sm:$0xff] }
  0xbf   : > { %1448 = vmatpush3.msra.mxu0 %v580_v29  ;;  %817 = vmatpush1.msra.mxu1 %v602_v36  ;;  %v663_v8 = vld [vmem:[#allocation10 + $0x38] sm:$0xff]  ;;  %v641_v10 = vld [vmem:[#allocation8 + $0x188] sm:$0xff]  ;;  %v662_v11 = vld [vmem:[#allocation10 + $0x30] sm:$0xff] }
  0xc0   : > { %1449 = vmatprep.subr.mxu0 %v1997_v0  ;;  %818 = vmatprep.subr.mxu1 %v601_v37  ;;  %v640_v12 = vld [vmem:[#allocation8 + $0x180] sm:$0xff]  ;;  %v639_v13 = vld [vmem:[#allocation8 + $0x178] sm:$0xff]  ;;  %v661_v14 = vld [vmem:[#allocation10 + $0x28] sm:$0xff] }
  0xc1   : > { %1450 = vmatpush3.msra.mxu0 %v579_v32  ;;  %819 = vmatpush1.msra.mxu1 %v600_v39  ;;  %v638_v15 = vld [vmem:[#allocation8 + $0x170] sm:$0xff]  ;;  %v637_v16 = vld [vmem:[#allocation8 + $0x168] sm:$0xff]  ;;  %v660_v17 = vld [vmem:[#allocation10 + $0x20] sm:$0xff] }
  0xc2   : > { %1451 = vmatprep.subr.mxu0 %v1997_v0  ;;  %820 = vmatprep.subr.mxu1 %v599_v40  ;;  %v636_v18 = vld [vmem:[#allocation8 + $0x160] sm:$0xff]  ;;  %v635_v19 = vld [vmem:[#allocation8 + $0x158] sm:$0xff]  ;;  %v634_v21 = vld [vmem:[#allocation8 + $0x150] sm:$0xff] }
  0xc3   : > { %1452 = vmatpush3.msra.mxu0 %v578_v35  ;;  %821 = vmatpush1.msra.mxu1 %v598_v42  ;;  %v659_v20 = vld [vmem:[#allocation10 + $0x18] sm:$0xff]  ;;  %v633_v22 = vld [vmem:[#allocation8 + $0x148] sm:$0xff]  ;;  %v658_v23 = vld [vmem:[#allocation10 + $0x10] sm:$0xff] }
  0xc4   : > { %1453 = vmatprep.subr.mxu0 %v1997_v0  ;;  %822 = vmatprep.subr.mxu1 %v597_v44  ;;  %v632_v24 = vld [vmem:[#allocation8 + $0x140] sm:$0xff]  ;;  %v631_v25 = vld [vmem:[#allocation8 + $0x138] sm:$0xff]  ;;  %v630_v26 = vld [vmem:[#allocation8 + $0x130] sm:$0xff] }
  0xc5   : > { %1454 = vmatpush3.msra.mxu0 %v577_v38  ;;  %823 = vmatpush1.msra.mxu1 %v596_v45  ;;  %v629_v27 = vld [vmem:[#allocation8 + $0x128] sm:$0xff]  ;;  %v628_v28 = vld [vmem:[#allocation8 + $0x120] sm:$0xff]  ;;  %v627_v29 = vld [vmem:[#allocation8 + $0x118] sm:$0xff] }
  0xc6   : > { %1455 = vmatprep.subr.mxu0 %v1997_v0  ;;  %824 = vmatprep.subr.mxu1 %v595_v46  ;;  %v657_v30 = vld [vmem:[#allocation10 + $0x8] sm:$0xff]  ;;  %v626_v31 = vld [vmem:[#allocation8 + $0x110] sm:$0xff]  ;;  %v656_v33 = vld [vmem:[#allocation10] sm:$0xff] }
  0xc7   : > { %1456 = vmatpush3.msra.mxu0 %v576_v41  ;;  %825 = vmatpush1.msra.mxu1 %v594_v48  ;;  %v625_v32 = vld [vmem:[#allocation8 + $0x108] sm:$0xff]  ;;  %v624_v34 = vld [vmem:[#allocation8 + $0x100] sm:$0xff]  ;;  %v2335_v35 = vld [vmem:[%s503_s15] sm:$0xff]  ;;  %s1874_s15 = scalar_lea.vmem %s1152_s4, 128 }
  0xc8   : > { %1458 = vmatmul.mubr.f32.vlgmr.msra.gmra.mxu0 %v704_v43  ;;  %1460 = vmatprep.subr.mxu0 %v1997_v0  ;;  %v1345_v36 = vld [vmem:[%s2457_s3] ss:$0 sm:$0xff]  ;;  %v687_v41 = vld [vmem:[#allocation11 + $0x78] sm:$0xff]  ;;  %v686_v42 = vld [vmem:[#allocation11 + $0x70] sm:$0xff]  ;;  %p1875_p0 = scmp.ne.s32.totalorder %s1152_s4, %s1874_s15  ;;  %p1882_p3 = scmp.lt.s32.totalorder %s1880_s16, %s1874_s15 }
  0xc9   : > { %1461 = vmatpush3.msra.mxu0 %v671_v47  ;;  %826 = vmatprep.subr.mxu1 %v593_v49  ;;  %v685_v43 = vld [vmem:[#allocation11 + $0x68] sm:$0xff]  ;;  %v684_v44 = vld [vmem:[#allocation11 + $0x60] sm:$0xff]  ;;  %v683_v45 = vld [vmem:[#allocation11 + $0x58] sm:$0xff] }
  0xca   : > { %1462 = vmatprep.subr.mxu0 %v1997_v0  ;;  %827 = vmatpush1.msra.mxu1 %v592_v51  ;;  %v682_v46 = vld [vmem:[#allocation11 + $0x50] sm:$0xff]  ;;  %v681_v47 = vld [vmem:[#allocation11 + $0x48] sm:$0xff]  ;;  %v680_v48 = vld [vmem:[#allocation11 + $0x40] sm:$0xff]  ;;  %p1876_p5 = pnand %p1875_p0, %p2507_p13  ;;  %p1883_p4 = por %p1882_p3, %p1881_p1 }
  0xcb   : > { %1463 = vmatpush3.msra.mxu0 %v670_v50  ;;  %828 = vmatprep.subr.mxu1 %v655_v52  ;;  %v679_v49 = vld [vmem:[#allocation11 + $0x38] sm:$0xff]  ;;  %v678_v50 = vld [vmem:[#allocation11 + $0x30] sm:$0xff]  ;;  %v677_v51 = vld [vmem:[#allocation11 + $0x28] sm:$0xff] }
  0xcc   : > { %1464 = vmatprep.subr.mxu0 %v1997_v0  ;;  %829 = vmatpush2.msra.mxu1 %v654_v54  ;;  %v676_v52 = vld [vmem:[#allocation11 + $0x20] sm:$0xff]  ;;  %v674_v54 = vld [vmem:[#allocation11 + $0x10] sm:$0xff]  ;;  %p1877_p9 = pneg %p1876_p5 }
  0xcd   : > { %1465 = vmatpush3.msra.mxu0 %v669_v53  ;;  %830 = vmatprep.subr.mxu1 %v653_v55  ;;  %v675_v53 = vld [vmem:[#allocation11 + $0x18] sm:$0xff]  ;;  %v673_v55 = vld [vmem:[#allocation11 + $0x8] sm:$0xff] }
  0xce   : > { %1466 = vmatprep.subr.mxu0 %v1997_v0  ;;  %831 = vmatpush2.msra.mxu1 %v652_v57  ;;  %v703_v57 = vld [vmem:[#allocation13 + $0x78] sm:$0xff]  ;;  %p1884_p8 = pnand %p1883_p4, %p1877_p9 }
  0xcf   : > { %1467 = vmatpush3.msra.mxu0 %v668_v56  ;;  %832 = vmatprep.subr.mxu1 %v651_v58  ;;  %v672_v56 = vld [vmem:[#allocation11] sm:$0xff]  ;;  %v702_v58 = vld [vmem:[#allocation13 + $0x70] sm:$0xff] }
  0xd0   : > { %1468 = vmatprep.subr.mxu0 %v1997_v0  ;;  %833 = vmatpush2.msra.mxu1 %v650_v60  ;;  %v700_v60 = vld [vmem:[#allocation13 + $0x60] sm:$0xff] }
  0xd1   : > { %1469 = vmatpush3.msra.mxu0 %v667_v59  ;;  %834 = vmatprep.subr.mxu1 %v649_v61  ;;  %v701_v59 = vld [vmem:[#allocation13 + $0x68] sm:$0xff]  ;;  %v699_v61 = vld [vmem:[#allocation13 + $0x58] sm:$0xff] }
  0xd2   : > { %1470 = vmatprep.subr.mxu0 %v1997_v0  ;;  %835 = vmatpush2.msra.mxu1 %v648_v63  ;;  %v697_v63 = vld [vmem:[#allocation13 + $0x48] sm:$0xff] }
  0xd3   : > { %1471 = vmatpush3.msra.mxu0 %v666_v62  ;;  %836 = vmatprep.subr.mxu1 %v647_v1  ;;  %v698_v62 = vld [vmem:[#allocation13 + $0x50] sm:$0xff]  ;;  %v696_v1 = vld [vmem:[#allocation13 + $0x40] sm:$0xff] }
  0xd4   : > { %1472 = vmatprep.subr.mxu0 %v1997_v0  ;;  %837 = vmatpush2.msra.mxu1 %v646_v3  ;;  %v694_v3 = vld [vmem:[#allocation13 + $0x30] sm:$0xff] }
  0xd5   : > { %1473 = vmatpush3.msra.mxu0 %v665_v2  ;;  %838 = vmatprep.subr.mxu1 %v645_v4  ;;  %v695_v2 = vld [vmem:[#allocation13 + $0x38] sm:$0xff]  ;;  %v693_v4 = vld [vmem:[#allocation13 + $0x28] sm:$0xff] }
  0xd6   : > { %1474 = vmatprep.subr.mxu0 %v1997_v0  ;;  %839 = vmatpush2.msra.mxu1 %v644_v6  ;;  %v691_v6 = vld [vmem:[#allocation13 + $0x18] sm:$0xff] }
  0xd7   : > { %1475 = vmatpush3.msra.mxu0 %v664_v5  ;;  %840 = vmatprep.subr.mxu1 %v643_v7  ;;  %v692_v5 = vld [vmem:[#allocation13 + $0x20] sm:$0xff]  ;;  %v690_v7 = vld [vmem:[#allocation13 + $0x10] sm:$0xff] }
  0xd8   : > { %1476 = vmatprep.subr.mxu0 %v1997_v0  ;;  %841 = vmatpush2.msra.mxu1 %v642_v9  ;;  %v688_v9 = vld [vmem:[#allocation13] sm:$0xff] }
  0xd9   : > { %1477 = vmatpush3.msra.mxu0 %v663_v8  ;;  %842 = vmatprep.subr.mxu1 %v641_v10  ;;  %v689_v8 = vld [vmem:[#allocation13 + $0x8] sm:$0xff]  ;;  %v786_v10 = vlaneseq }
  0xda   : > { %1478 = vmatprep.subr.mxu0 %v1997_v0  ;;  %843 = vmatpush2.msra.mxu1 %v640_v12 }
  0xdb   : > { %1479 = vmatpush3.msra.mxu0 %v662_v11  ;;  %844 = vmatprep.subr.mxu1 %v639_v13  ;;  %v787_v11 = vshrl.u32 %v786_v10, 7  ;;  %v784_v13 = vld [vmem:[%s2459_s5] sm:$0x3] }
  0xdc   : > { %1480 = vmatprep.subr.mxu0 %v1997_v0  ;;  %845 = vmatpush2.msra.mxu1 %v638_v15 }
  0xdd   : > { %1481 = vmatpush3.msra.mxu0 %v661_v14  ;;  %846 = vmatprep.subr.mxu1 %v637_v16  ;;  %v788_v12 = vsub.s32 0, %v787_v11  ;;  %v792_v15 = vsub.s32 1, %v787_v11 }
  0xde   : > { %1482 = vmatprep.subr.mxu0 %v1997_v0  ;;  %847 = vmatpush2.msra.mxu1 %v636_v18 }
  0xdf   : > { %1483 = vmatpush3.msra.mxu0 %v660_v17  ;;  %848 = vmatprep.subr.mxu1 %v635_v19  ;;  %v789_v14 = vrot.slane %v784_v13, %v788_v12 }
  0xe0   : > { %1484 = vmatprep.subr.mxu0 %v1997_v0  ;;  %849 = vmatpush2.msra.mxu1 %v634_v21  ;;  %v793_v21 = vrot.slane %v784_v13, %v792_v15 }
  0xe1   : > { %1485 = vmatpush3.msra.mxu0 %v659_v20  ;;  %850 = vmatprep.subr.mxu1 %v633_v22 }
  0xe2   : > { %1486 = vmatprep.subr.mxu0 %v1997_v0  ;;  %851 = vmatpush2.msra.mxu1 %v632_v24 }
  0xe3   : > { %1487 = vmatpush3.msra.mxu0 %v658_v23  ;;  %852 = vmatprep.subr.mxu1 %v631_v25 }
  0xe4   : > { %1488 = vmatprep.subr.mxu0 %v1997_v0  ;;  %1492 = vmatprep.mubr.msk.f32.mxu0 %vm1998_vm0, %v1997_v0 }
  0xe5   : > { %853 = vmatpush2.msra.mxu1 %v630_v26  ;;  %1489 = vmatpush3.msra.mxu0 %v657_v30 }
  0xe6   : > { %854 = vmatprep.subr.mxu1 %v629_v27  ;;  %1490 = vmatprep.subr.mxu0 %v1997_v0  ;;  %v1349_v27 = vld [vmem:[%s2463_s9] ss:$0 sm:$0xff] }
  0xe7   : > { %855 = vmatpush2.msra.mxu1 %v628_v28  ;;  %1491 = vmatpush3.msra.mxu0 %v656_v33 }
  0xe8   : > { %856 = vmatprep.subr.mxu1 %v627_v29  ;;  %860 = vmatprep.mubr.f32.mxu1 %v2335_v35  ;;  %v1348_v29 = vld [vmem:[%s2461_s7] ss:$0 sm:$0xff] }
  0xe9   : > { %857 = vmatpush2.msra.mxu1 %v626_v31  ;;  %1495 = vmatprep.subr.mxu0 %v1997_v0 }
  0xea   : > { %858 = vmatprep.subr.mxu1 %v625_v32 }
  0xeb   : > { %859 = vmatpush2.msra.mxu1 %v624_v34 }
  0xec   : > { %1530 = vmatprep.subr.mxu1 %v1997_v0 }
 0x188   : > { %v779_v37 = vpop.f32.mrf.mxu0 }
 0x189   : > { %v780_v38 = vadd.f32 %v1345_v36, %v779_v37 }
 0x18a   : > { %v1459_v39 = vpop.f32.mrf.mxu0 }
 0x18b   : > { %v783_v40 = vmax.f32 %v780_v38, 0.0 }
 0x18d   : > { %861 = vmatmul.mubr.f32.vlgmr.msra.gmra.mxu1 %v783_v40  ;;  %1493 = vmatmul.mubr.f32.vlgmr.msra.gmra.mxu0 %v783_v40 }
 0x18e   : > { %1496 = vmatpush3.msra.mxu0 %v687_v41  ;;  %1527 = vmatprep.mubr.msk.f32.mxu0 %vm1998_vm0, %v1997_v0 }
 0x18f   : > { %1497 = vmatprep.subr.mxu0 %v1997_v0  ;;  %1562 = vmatprep.mubr.msk.f32.mxu1 %vm1998_vm0, %v1997_v0 }
 0x190   : > { %1498 = vmatpush3.msra.mxu0 %v686_v42  ;;  %1531 = vmatpush3.msra.mxu1 %v703_v57 }
 0x191   : > { %1499 = vmatprep.subr.mxu0 %v1997_v0  ;;  %1532 = vmatprep.subr.mxu1 %v1997_v0 }
 0x192   : > { %1500 = vmatpush3.msra.mxu0 %v685_v43  ;;  %1533 = vmatpush3.msra.mxu1 %v702_v58 }
 0x193   : > { %1501 = vmatprep.subr.mxu0 %v1997_v0  ;;  %1534 = vmatprep.subr.mxu1 %v1997_v0 }
 0x194   : > { %1502 = vmatpush3.msra.mxu0 %v684_v44  ;;  %1535 = vmatpush3.msra.mxu1 %v701_v59 }
 0x195   : > { %1503 = vmatprep.subr.mxu0 %v1997_v0  ;;  %1536 = vmatprep.subr.mxu1 %v1997_v0 }
 0x196   : > { %1504 = vmatpush3.msra.mxu0 %v683_v45  ;;  %1537 = vmatpush3.msra.mxu1 %v700_v60 }
 0x197   : > { %1505 = vmatprep.subr.mxu0 %v1997_v0  ;;  %1538 = vmatprep.subr.mxu1 %v1997_v0 }
 0x198   : > { %1506 = vmatpush3.msra.mxu0 %v682_v46  ;;  %1539 = vmatpush3.msra.mxu1 %v699_v61 }
 0x199   : > { %1507 = vmatprep.subr.mxu0 %v1997_v0  ;;  %1540 = vmatprep.subr.mxu1 %v1997_v0 }
 0x19a   : > { %1508 = vmatpush3.msra.mxu0 %v681_v47  ;;  %1541 = vmatpush3.msra.mxu1 %v698_v62 }
 0x19b   : > { %1509 = vmatprep.subr.mxu0 %v1997_v0  ;;  %1542 = vmatprep.subr.mxu1 %v1997_v0 }
 0x19c   : > { %1510 = vmatpush3.msra.mxu0 %v680_v48  ;;  %1543 = vmatpush3.msra.mxu1 %v697_v63 }
 0x19d   : > { %1511 = vmatprep.subr.mxu0 %v1997_v0  ;;  %1544 = vmatprep.subr.mxu1 %v1997_v0 }
 0x19e   : > { %1512 = vmatpush3.msra.mxu0 %v679_v49  ;;  %1545 = vmatpush3.msra.mxu1 %v696_v1 }
 0x19f   : > { %1513 = vmatprep.subr.mxu0 %v1997_v0  ;;  %1546 = vmatprep.subr.mxu1 %v1997_v0 }
 0x1a0   : > { %1514 = vmatpush3.msra.mxu0 %v678_v50  ;;  %1547 = vmatpush3.msra.mxu1 %v695_v2 }
 0x1a1   : > { %1515 = vmatprep.subr.mxu0 %v1997_v0  ;;  %1548 = vmatprep.subr.mxu1 %v1997_v0 }
 0x1a2   : > { %1516 = vmatpush3.msra.mxu0 %v677_v51  ;;  %1549 = vmatpush3.msra.mxu1 %v694_v3 }
 0x1a3   : > { %1517 = vmatprep.subr.mxu0 %v1997_v0  ;;  %1550 = vmatprep.subr.mxu1 %v1997_v0 }
 0x1a4   : > { %1518 = vmatpush3.msra.mxu0 %v676_v52  ;;  %1551 = vmatpush3.msra.mxu1 %v693_v4 }
 0x1a5   : > { %1519 = vmatprep.subr.mxu0 %v1997_v0  ;;  %1552 = vmatprep.subr.mxu1 %v1997_v0 }
 0x1a6   : > { %1520 = vmatpush3.msra.mxu0 %v675_v53  ;;  %1553 = vmatpush3.msra.mxu1 %v692_v5 }
 0x1a7   : > { %1521 = vmatprep.subr.mxu0 %v1997_v0  ;;  %1554 = vmatprep.subr.mxu1 %v1997_v0 }
 0x1a8   : > { %1522 = vmatpush3.msra.mxu0 %v674_v54  ;;  %1555 = vmatpush3.msra.mxu1 %v691_v6 }
 0x1a9   : > { %1523 = vmatprep.subr.mxu0 %v1997_v0  ;;  %1556 = vmatprep.subr.mxu1 %v1997_v0 }
 0x1aa   : > { %1524 = vmatpush3.msra.mxu0 %v673_v55  ;;  %1557 = vmatpush3.msra.mxu1 %v690_v7 }
 0x1ab   : > { %1525 = vmatprep.subr.mxu0 %v1997_v0  ;;  %1558 = vmatprep.subr.mxu1 %v1997_v0 }
 0x1ac   : > { %1526 = vmatpush3.msra.mxu0 %v672_v56  ;;  %1559 = vmatpush3.msra.mxu1 %v689_v8 }
 0x1ad   : > { %1528 = vmatmul.mubr.f32.vlgmr.msra.gmra.mxu0 %v2335_v35  ;;  %1560 = vmatprep.subr.mxu1 %v1997_v0 }
 0x1ae   : > { %1561 = vmatpush3.msra.mxu1 %v688_v9 }
 0x24d   : > { %v862_v16 = vpop.f32.mrf.mxu1  ;;  %v952_v17 = vpop.f32.mrf.mxu0 }
 0x24e   : > { %v863_v18 = vadd.f32 %v862_v16, %v789_v14  ;;  %v953_v34 = vadd.f32 %v1348_v29, %v952_v17 }
 0x24f   : > { %v1494_v19 = vpop.f32.mrf.mxu0  ;;  %v864_v22 = vpop.f32.mrf.mxu1 }
 0x250   : > { %v1346_v20 = vmul.f32 -1.442695, %v863_v18  ;;  %v865_v23 = vadd.f32 %v864_v22, %v793_v21 }
 0x252   : > { %1678 = vpow2.f32 %v1346_v20  ;;  %v1347_v0 = vmul.f32 -1.442695, %v865_v23 }
 0x254   : > { %1680 = vpow2.f32 %v1347_v0 }
 0x25f   : > { %v1679_v24 = vpop.eup %1678 }
 0x260   : > { %v870_v25 = vadd.f32 1.0, %v1679_v24 }
 0x261   : > { %v1681_v26 = vpop.eup %1680 }
 0x262   : > { %1682 = vrcp.f32 %v870_v25  ;;  %v876_v28 = vadd.f32 1.0, %v1681_v26 }
 0x264   : > { %1684 = vrcp.f32 %v876_v28 }
 0x26d   : > { %v1029_v30 = vpop.f32.mrf.mxu0 }
 0x26e   : > { %v1030_v31 = vadd.f32 %v1349_v27, %v1029_v30 }
 0x26f   : > { %v1683_v32 = vpop.eup %1682  ;;  %v1529_v33 = vpop.f32.mrf.mxu0 }
 0x270   : > { %v1033_v36 = vmul.f32 %v1683_v32, %v1030_v31 }
 0x271   : > { %v1685_v38 = vpop.eup %1684 }
 0x272   : > { %v1034_v37 = vadd.f32 %v1033_v36, %v953_v34  ;;  %v1036_v39 = vsub.f32 1.0, %v1685_v38  ;;  %v1038_v42 = vmul.f32 %v1685_v38, %v2335_v35 }
 0x274   : > { %1686 = vtanh.f32 %v1034_v37 }
 0x281   : > { %v1687_v40 = vpop.eup %1686 }
 0x282   : > { %v1037_v41 = vmul.f32 %v1687_v40, %v1036_v39 }
 0x284   : > { %v1039_v43 = vadd.f32 %v1038_v42, %v1037_v41 }
 0x286   : > { %1563 = vmatmul.mubr.f32.vlgmr.msra.gmra.mxu1 %v1039_v43  ;;  %1040 = vst [vmem:[%s575_s17] sm:$0xff] %v1039_v43 }
 0x287   : > { %1887 = shalt.err (!%p1884_p8)
}
 0x288   : > { %s1888_s6 = scalar_lea.hbm %s1149_s22, 128  ;;  %s1892_s30 = scalar_lea.hbm %s2467_s13, 256 }
 0x289   : > { %p1889_p7 = scmp.ne.s32.totalorder %s1149_s22, %s1888_s6  ;;  %p1893_p2 = scmp.lt.s32.totalorder %s1149_s22, %s2467_s13 }
 0x28a   : > { %p1894_p10 = scmp.lt.s32.totalorder %s1892_s30, %s1888_s6 }
 0x28b   : > { %p1890_p12 = pnand %p1889_p7, %p2507_p13 }
 0x28c   : > { %p1895_p11 = por %p1894_p10, %p1893_p2 }
 0x28d   : > { %p1891_p6 = pneg %p1890_p12 }
 0x28f   : > { %p1896_p0 = pnand %p1895_p11, %p1891_p6 }
 0x291   : > { %1899 = shalt.err (!%p1896_p0)
}
 0x292   : > { %1590 = dma.vmem_to_hbm [thread:$0]  (%p2507_p13), %s1152_s4, 128, %s1149_s22, %s1125_s10   ;;  %v1350_v35 = vld [vmem:[%s2465_s11] ss:$0 sm:$0xff] }
 0x293   : > { %s568_s15 = scalar_lea.vmem [#allocation14], %s2269_s21  ;;  %s2508_s6 = sld [smem:[#allocation33_spill]] }
 0x294   : > { %s1138_s2 = sshll.u32 %s568_s15, 4  ;;  %s1120_s24 = scalar_lea.sflag [#allocation4], %s2266_s27  ;;  %s1139_s2 = int_to_ptr.vmem [resolvable:$true] %s1138_s2 }
 0x295   : > { %s1900_s30 = scalar_lea.vmem %s1139_s2, 128  ;;  %s2000_s22 = smov [#allocation14]  }
 0x296   : > { %p1901_p5 = scmp.ne.s32.totalorder %s1139_s2, %s1900_s30  ;;  %s1904_s21 = sshll.u32 %s2000_s22, 4  ;;  %s1905_s21 = int_to_ptr.vmem [resolvable:$false] %s1904_s21 }
 0x297   : > { %s1906_s4 = scalar_lea.vmem %s1905_s21, 256  ;;  %p1907_p3 = scmp.lt.s32.totalorder %s1139_s2, %s1905_s21 }
 0x298   : > { %p1902_p9 = pnand %p1901_p5, %p2507_p13  ;;  %p1908_p4 = scmp.lt.s32.totalorder %s1906_s4, %s1900_s30 }
 0x299   : > { %s2417_s8 = scalar_lea.hbm %s2508_s6, %s1353_s18 }
 0x29a   : > { %p1903_p1 = pneg %p1902_p9  ;;  %p1909_p8 = por %p1908_p4, %p1907_p3 }
 0x29c   : > { %p1910_p7 = pnand %p1909_p8, %p1903_p1 }
 0x346   : > { %v1114_v44 = vpop.f32.mrf.mxu1 }
 0x347   : > { %v1115_v45 = vadd.f32 %v1350_v35, %v1114_v44 }
 0x348   : > { %v1564_v46 = vpop.f32.mrf.mxu1 }
 0x349   : > { %1118 = vst [vmem:[%s568_s15] sm:$0xff] %v1115_v45 }
 0x34a   : > { %1913 = shalt.err (!%p1910_p7)
}
 0x34b   : > { %s1914_s14 = scalar_lea.hbm %s2417_s8, 128  ;;  %s1918_s10 = scalar_lea.hbm %s2508_s6, 256 }
 0x34c   : > { %p1915_p12 = scmp.ne.s32.totalorder %s2417_s8, %s1914_s14  ;;  %p1919_p10 = scmp.lt.s32.totalorder %s2417_s8, %s2508_s6 }
 0x34d   : > { %p1920_p11 = scmp.lt.s32.totalorder %s1918_s10, %s1914_s14 }
 0x34e   : > { %p1916_p6 = pnand %p1915_p12, %p2507_p13 }
 0x34f   : > { %p1921_p0 = por %p1920_p11, %p1919_p10 }
 0x350   : > { %p1917_p2 = pneg %p1916_p6 }
 0x352   : > { %p1922_p5 = pnand %p1921_p0, %p1917_p2 }
 0x354   : > { %1925 = shalt.err (!%p1922_p5)
}
 0x355   : > { %1589 = dma.vmem_to_hbm [thread:$0]  (%p2507_p13), %s1139_s2, 128, %s2417_s8, %s1120_s24  }
 0x356 PF: > { %s2509_s19 = sld [smem:[#allocation27_spill]]  ;;  %s1163_s12 = sand.u32 1, %s1972_s25  }
 0x357   : > { %p2511_p1 = scmp.ge.s32.totalorder %s1984_s28, 2  ;;  %s1164_s15 = scalar_lea.sflag [#allocation4], %s1163_s12 }
 0x35c   : > { %p2510_p9 = scmp.ne.s32.totalorder %s2509_s19, 0 }
 0x35e   : > { %p1617_p3 = pnand %p2511_p1, %p2510_p9 }
 0x360   : > { %p1618_p4 = pneg %p1617_p3 }
 0x362   : > { %1963 = dma.done.wait (%p1618_p4), %s1164_s15, 128  }
 0x363   : > { %1965 = vsyncadd (%p1618_p4), %s1164_s15, 4294967168  ;;  %s1173_s29 = scalar_lea.sflag [#allocation16], %s1163_s12 }
 0x364   : > { %1967 = dma.done.wait (%p1618_p4), %s1173_s29, 128  }
 0x365   : > { %1969 = vsyncadd (%p1618_p4), %s1173_s29, 4294967168  ;;  %s2512_s28 = sld [smem:[#allocation25_spill]]  ;;  %s2515_s25 = smov %s1976_s26 }
 0x366   : > { %s2513_s23 = sld [smem:[#allocation24_spill]] }
 0x367   : > { %s2514_s27 = sld [smem:[#allocation26_spill]] }
 0x36b   : > { %p35_p13 = scmp.ge.s32.totalorder %s2512_s28, 4  }
 0x36c   : > { %s2516_s26 = smov %s2513_s23 }
 0x36d   :  { %37 = sbr.rel (!%p35_p13) target bundleno = 18 (0x12), region = 163 }
 0x372   :  { %1178 = vsyncpa [#allocation3], 1 }
 0x373   :  { %1180 = vsyncpa [#allocation3 + $0x1], 1 }
 0x374   :  { %1181 = vsyncpa [#allocation6], 1 }
 0x375   :  { %1183 = vsyncpa [#allocation6 + $0x1], 1 }
 0x376   :  { %1184 = vsyncpa [#allocation9], 1 }
 0x377   :  { %1185 = vsyncpa [#allocation12], 1 }
 0x378   :  { %1186 = vsyncpa [#allocation4], 1 }
 0x379   :  { %1188 = vsyncpa [#allocation4 + $0x1], 1 }
 0x37a   :  { %1189 = vsyncpa [#allocation16], 1 }
 0x37b   :  { %1191 = vsyncpa [#allocation16 + $0x1], 1 }

</bundles_post_ra>
